<compile_context>
chip_gen: v5e
topology: v5e:2x2
jax: 0.10.0
libtpu: 0.0.40
codegen_flags: <defaults>
</compile_context>

<pallas_src>
import functools

import jax
import jax.numpy as jnp
from jax.experimental import pallas as pl
from jax.experimental.pallas import tpu as pltpu


# ----------------------------------------------------------------------------------
# Fused Pallas kernel: Conv1d + BN + ReLU, Conv1d + BN + ReLU  (one invocation)
# ----------------------------------------------------------------------------------
def _unet_conv_kernel(x_ref, w1_ref, p1_ref, w2_ref, p2_ref, o_ref,
                      xp1_ref, xp2_ref, *, K, pad, eps):
    """x_ref: (N, Cin, L) f32; w*_ref: (K, Cout, Cin_layer) f32;
    p*_ref: (Cout, 3) f32 packed [conv-bias, gamma, beta];
    o_ref: (N, Cout, L) f32; xp*_ref: (N, C_layer, L + 2*pad) f32 VMEM scratch."""
    N, _, L = x_ref.shape

    def conv_bn_relu(x_val, xp_ref, w_ref, p_ref):
        _, Co, Cx = w_ref.shape                      # (K, Cout, Cin_layer)

        # Zero-padded copy of the activation along the lane-dense L axis:
        # pre-zeroed VMEM scratch + one store (review item: no misaligned concat).
        xp_ref[...] = jnp.zeros_like(xp_ref)
        xp_ref[:, :, pl.ds(pad, L)] = x_val
        xp = xp_ref[...]                             # (N, Cx, L + 2*pad)

        # K accumulated dots over shifted views (no im2col materialization).
        # Each tap: (Cout, Cx) @ (Cx, L) per batch row -> (N, Cout, L), with the
        # lane-dense L axis as the MXU output width; f32 in, f32 accumulate.
        acc = jnp.zeros((N, Co, L), jnp.float32)
        for k in range(K):                           # static unroll, 9 taps
            wk = jnp.broadcast_to(w_ref[k], (N, Co, Cx))   # tiny (<=2*8*8) broadcast
            view = xp[:, :, k:k + L]                 # lane-shifted tap view
            acc = acc + jax.lax.dot_general(
                wk, view,
                dimension_numbers=(((2,), (1,)), ((0,), (0,))),
                preferred_element_type=jnp.float32)

        pp = p_ref[...]                              # (Cout, 3): [bias, gamma, beta]
        b, g, bt = pp[None, :, 0:1], pp[None, :, 1:2], pp[None, :, 2:3]
        y = acc + b                                  # conv bias (f32)

        # BatchNorm1d, training-mode batch statistics (biased variance), per
        # channel over N*L — single pass: sum & sum-of-squares in f32.
        inv_cnt = 1.0 / float(N * L)
        s1 = jnp.sum(jnp.sum(y, axis=0, keepdims=True), axis=2, keepdims=True)
        s2 = jnp.sum(jnp.sum(y * y, axis=0, keepdims=True), axis=2, keepdims=True)
        mean = s1 * inv_cnt
        var = s2 * inv_cnt - mean * mean
        scale = g * jax.lax.rsqrt(var + eps)         # EUP
        shift = bt - mean * scale
        return jnp.maximum(y * scale + shift, 0.0)   # fused affine + ReLU (f32)

    h = conv_bn_relu(x_ref[...], xp1_ref, w1_ref, p1_ref)   # (N, Cout, L)
    o_ref[...] = conv_bn_relu(h, xp2_ref, w2_ref, p2_ref)   # single lane-dense store


# ----------------------------------------------------------------------------------
# Wrapper (PyTorch-equivalent interface: NCL in, NCL out — no layout ops needed)
# ----------------------------------------------------------------------------------
def unet_conv_forward(x_ncl, params, *, eps=1e-5):
    """x_ncl: (N, Cin, L) -> (N, Cout, L), matching UNetConv.forward in train mode."""
    N, Cin, L = x_ncl.shape
    K, pad = params["K"], params["pad"]
    Cout = params["p1"].shape[0]
    Lp = L + 2 * pad

    kern = functools.partial(_unet_conv_kernel, K=K, pad=pad, eps=eps)
    vmem = pl.BlockSpec(memory_space=pltpu.MemorySpace.VMEM)

    # Advisory cost estimate + VMEM limit sized to the actual resident buffers.
    flops = 2 * K * N * L * Cout * (Cin + Cout) + 20 * N * L * Cout
    bytes_accessed = 4 * (N * Cin * L + N * Cout * L
                          + K * Cout * (Cin + Cout) + 6 * Cout)
    vmem_need = 4 * (N * Cin * L + 2 * N * Cout * L + N * Cin * Lp + N * Cout * Lp
                     + K * Cout * (Cin + Cout) + 6 * Cout)
    vmem_limit = int(min(64 * 1024 * 1024, max(16 * 1024 * 1024, 8 * vmem_need)))

    return pl.pallas_call(
        kern,
        out_shape=jax.ShapeDtypeStruct((N, Cout, L), jnp.float32),
        in_specs=[vmem] * 5,
        out_specs=vmem,
        scratch_shapes=[pltpu.VMEM((N, Cin, Lp), jnp.float32),
                        pltpu.VMEM((N, Cout, Lp), jnp.float32)],
        compiler_params=pltpu.CompilerParams(vmem_limit_bytes=vmem_limit),
        cost_estimate=pl.CostEstimate(flops=flops, transcendentals=2 * Cout,
                                      bytes_accessed=bytes_accessed),
    )(x_ncl.astype(jnp.float32),
      params["w1"], params["p1"], params["w2"], params["p2"])


# ----------------------------------------------------------------------------------
# Parameter init (matches the PyTorch module's shapes / default init)
# ----------------------------------------------------------------------------------
def _torch_conv1d_init(key, cin, cout, K):
    kw, kb = jax.random.split(key)
    s = 1.0 / float(cin * K) ** 0.5
    w = jax.random.uniform(kw, (cout, cin, K), jnp.float32, -s, s)   # PyTorch layout
    b = jax.random.uniform(kb, (cout,), jnp.float32, -s, s)
    return w, b


def init_unet_conv_params(key, in_channels, out_channels, *, K=9, pad=4):
    k1, k2 = jax.random.split(key)
    w1, b1 = _torch_conv1d_init(k1, in_channels, out_channels, K)
    w2, b2 = _torch_conv1d_init(k2, out_channels, out_channels, K)
    g = jnp.ones((out_channels,), jnp.float32)       # BN gamma (init 1)
    bt = jnp.zeros((out_channels,), jnp.float32)     # BN beta  (init 0)
    return dict(
        K=K, pad=pad,
        w1_torch=w1, w2_torch=w2,                    # kept for the f32 reference
        b1_vec=b1, b2_vec=b2,
        w1=jnp.transpose(w1, (2, 0, 1)),             # (K, Cout, Cin)
        w2=jnp.transpose(w2, (2, 0, 1)),             # (K, Cout, Cout)
        p1=jnp.stack([b1, g, bt], axis=1),           # (Cout, 3): [bias, gamma, beta]
        p2=jnp.stack([b2, g, bt], axis=1),
    )


# ----------------------------------------------------------------------------------
# Pure-JAX f32 reference (PyTorch semantics) for a correctness check
# ----------------------------------------------------------------------------------
def unet_conv_reference(x_ncl, params, eps=1e-5):
    pad = params["pad"]

    def conv(x, w, b):
        y = jax.lax.conv_general_dilated(
            x, w, window_strides=(1,), padding=[(pad, pad)],
            dimension_numbers=("NCH", "OIH", "NCH"))
        return y + b.reshape(1, -1, 1)

    def bn_relu(y, g, bt):
        mean = jnp.mean(y, axis=(0, 2), keepdims=True)
        var = jnp.mean(jnp.square(y - mean), axis=(0, 2), keepdims=True)
        y = (y - mean) * jax.lax.rsqrt(var + eps) * g.reshape(1, -1, 1) \
            + bt.reshape(1, -1, 1)
        return jnp.maximum(y, 0.0)

    y = bn_relu(conv(x_ncl, params["w1_torch"], params["b1_vec"]),
                params["p1"][:, 1], params["p1"][:, 2])
    y = bn_relu(conv(y, params["w2_torch"], params["b2_vec"]),
                params["p2"][:, 1], params["p2"][:, 2])
    return y


# ----------------------------------------------------------------------------------
if __name__ == "__main__":
    key = jax.random.PRNGKey(0)
    k_params, k_x = jax.random.split(key)

    # Small shapes; L = 128 keeps the output last dim lane-dense (unmasked stores).
    N, Cin, Cout, L = 2, 4, 8, 128
    params = init_unet_conv_params(k_params, Cin, Cout)
    x = jax.random.normal(k_x, (N, Cin, L), jnp.float32)

    y = jax.block_until_ready(unet_conv_forward(x, params))

    assert y.shape == (N, Cout, L), y.shape
    assert bool(jnp.all(jnp.isfinite(y)))

    y_ref = unet_conv_reference(x, params)
    max_err = float(jnp.max(jnp.abs(y - y_ref)))
    assert max_err < 1e-2, f"max abs error vs f32 reference: {max_err}"

    print("KERNEL_OK")
</pallas_src>

<mosaic_0001>
module attributes {stable_mosaic.version = 11 : i64} {
  func.func @_unet_conv_kernel(%arg0: memref<2x4x128xf32, #tpu.memory_space<vmem>>, %arg1: memref<9x8x4xf32, #tpu.memory_space<vmem>>, %arg2: memref<8x3xf32, #tpu.memory_space<vmem>>, %arg3: memref<9x8x8xf32, #tpu.memory_space<vmem>>, %arg4: memref<8x3xf32, #tpu.memory_space<vmem>>, %arg5: memref<2x8x128xf32, #tpu.memory_space<vmem>>, %arg6: memref<2x4x136xf32, #tpu.memory_space<vmem>>, %arg7: memref<2x8x136xf32, #tpu.memory_space<vmem>>) attributes {dimension_semantics = [], scalar_prefetch = 0 : i64, scratch_operands = 2 : i64, tpu.core_type = #tpu.core_type<tc>} {
    %c0 = arith.constant 0 : index
    %c0_0 = arith.constant 0 : index
    %c0_1 = arith.constant 0 : index
    %0 = vector.load %arg0[%c0, %c0_0, %c0_1] : memref<2x4x128xf32, #tpu.memory_space<vmem>>, vector<2x4x128xf32>
    %cst = arith.constant 0.000000e+00 : f32
    %1 = vector.broadcast %cst : f32 to vector<2x4x136xf32>
    %c0_2 = arith.constant 0 : index
    %c0_3 = arith.constant 0 : index
    %c0_4 = arith.constant 0 : index
    %2 = vector.load %arg6[%c0_2, %c0_3, %c0_4] : memref<2x4x136xf32, #tpu.memory_space<vmem>>, vector<2x4x136xf32>
    tpu.vector_store %arg6[%c0_2, %c0_3, %c0_4], %1 {strides = array<i32>} : memref<2x4x136xf32, #tpu.memory_space<vmem>>, vector<2x4x136xf32>,
    %c0_5 = arith.constant 0 : index
    %c0_6 = arith.constant 0 : index
    %c4 = arith.constant 4 : index
    %3 = vector.load %arg6[%c0_5, %c0_6, %c4] : memref<2x4x136xf32, #tpu.memory_space<vmem>>, vector<2x4x128xf32>
    tpu.vector_store %arg6[%c0_5, %c0_6, %c4], %0 {strides = array<i32>} : memref<2x4x136xf32, #tpu.memory_space<vmem>>, vector<2x4x128xf32>,
    %c0_7 = arith.constant 0 : index
    %c0_8 = arith.constant 0 : index
    %c0_9 = arith.constant 0 : index
    %4 = vector.load %arg6[%c0_7, %c0_8, %c0_9] : memref<2x4x136xf32, #tpu.memory_space<vmem>>, vector<2x4x136xf32>
    %cst_10 = arith.constant 0.000000e+00 : f32
    %5 = vector.broadcast %cst_10 : f32 to vector<2x8x128xf32>
    %c0_11 = arith.constant 0 : index
    %c0_12 = arith.constant 0 : index
    %c0_13 = arith.constant 0 : index
    %6 = vector.load %arg1[%c0_11, %c0_12, %c0_13] : memref<9x8x4xf32, #tpu.memory_space<vmem>>, vector<1x8x4xf32>
    %7 = vector.shape_cast %6 : vector<1x8x4xf32> to vector<8x4xf32>
    %8 = vector.shape_cast %7 : vector<8x4xf32> to vector<1x8x4xf32>
    %9 = vector.broadcast %8 : vector<1x8x4xf32> to vector<2x8x4xf32>
    %10 = vector.extract_strided_slice %4 {offsets = [0, 0, 0], sizes = [2, 4, 128], strides = [1, 1, 1]} : vector<2x4x136xf32> to vector<2x4x128xf32>
    %cst_14 = arith.constant dense<0.000000e+00> : vector<2x8x128xf32>
    %11 = tpu.matmul %9, %10, %cst_14 {dimension_numbers = #tpu.dot_dimension_numbers<[2], [1], [1], [2], [0, 0, 0, 1, 1, 2], [0], [0]>} : vector<2x8x4xf32>, vector<2x4x128xf32>, vector<2x8x128xf32> -> vector<2x8x128xf32>
    %12 = arith.addf %5, %11 : vector<2x8x128xf32>
    %c1 = arith.constant 1 : index
    %c0_15 = arith.constant 0 : index
    %c0_16 = arith.constant 0 : index
    %13 = vector.load %arg1[%c1, %c0_15, %c0_16] : memref<9x8x4xf32, #tpu.memory_space<vmem>>, vector<1x8x4xf32>
    %14 = vector.shape_cast %13 : vector<1x8x4xf32> to vector<8x4xf32>
    %15 = vector.shape_cast %14 : vector<8x4xf32> to vector<1x8x4xf32>
    %16 = vector.broadcast %15 : vector<1x8x4xf32> to vector<2x8x4xf32>
    %17 = vector.extract_strided_slice %4 {offsets = [0, 0, 1], sizes = [2, 4, 128], strides = [1, 1, 1]} : vector<2x4x136xf32> to vector<2x4x128xf32>
    %cst_17 = arith.constant dense<0.000000e+00> : vector<2x8x128xf32>
    %18 = tpu.matmul %16, %17, %cst_17 {dimension_numbers = #tpu.dot_dimension_numbers<[2], [1], [1], [2], [0, 0, 0, 1, 1, 2], [0], [0]>} : vector<2x8x4xf32>, vector<2x4x128xf32>, vector<2x8x128xf32> -> vector<2x8x128xf32>
    %19 = arith.addf %12, %18 : vector<2x8x128xf32>
    %c2 = arith.constant 2 : index
    %c0_18 = arith.constant 0 : index
    %c0_19 = arith.constant 0 : index
    %20 = vector.load %arg1[%c2, %c0_18, %c0_19] : memref<9x8x4xf32, #tpu.memory_space<vmem>>, vector<1x8x4xf32>
    %21 = vector.shape_cast %20 : vector<1x8x4xf32> to vector<8x4xf32>
    %22 = vector.shape_cast %21 : vector<8x4xf32> to vector<1x8x4xf32>
    %23 = vector.broadcast %22 : vector<1x8x4xf32> to vector<2x8x4xf32>
    %24 = vector.extract_strided_slice %4 {offsets = [0, 0, 2], sizes = [2, 4, 128], strides = [1, 1, 1]} : vector<2x4x136xf32> to vector<2x4x128xf32>
    %cst_20 = arith.constant dense<0.000000e+00> : vector<2x8x128xf32>
    %25 = tpu.matmul %23, %24, %cst_20 {dimension_numbers = #tpu.dot_dimension_numbers<[2], [1], [1], [2], [0, 0, 0, 1, 1, 2], [0], [0]>} : vector<2x8x4xf32>, vector<2x4x128xf32>, vector<2x8x128xf32> -> vector<2x8x128xf32>
    %26 = arith.addf %19, %25 : vector<2x8x128xf32>
    %c3 = arith.constant 3 : index
    %c0_21 = arith.constant 0 : index
    %c0_22 = arith.constant 0 : index
    %27 = vector.load %arg1[%c3, %c0_21, %c0_22] : memref<9x8x4xf32, #tpu.memory_space<vmem>>, vector<1x8x4xf32>
    %28 = vector.shape_cast %27 : vector<1x8x4xf32> to vector<8x4xf32>
    %29 = vector.shape_cast %28 : vector<8x4xf32> to vector<1x8x4xf32>
    %30 = vector.broadcast %29 : vector<1x8x4xf32> to vector<2x8x4xf32>
    %31 = vector.extract_strided_slice %4 {offsets = [0, 0, 3], sizes = [2, 4, 128], strides = [1, 1, 1]} : vector<2x4x136xf32> to vector<2x4x128xf32>
    %cst_23 = arith.constant dense<0.000000e+00> : vector<2x8x128xf32>
    %32 = tpu.matmul %30, %31, %cst_23 {dimension_numbers = #tpu.dot_dimension_numbers<[2], [1], [1], [2], [0, 0, 0, 1, 1, 2], [0], [0]>} : vector<2x8x4xf32>, vector<2x4x128xf32>, vector<2x8x128xf32> -> vector<2x8x128xf32>
    %33 = arith.addf %26, %32 : vector<2x8x128xf32>
    %c4_24 = arith.constant 4 : index
    %c0_25 = arith.constant 0 : index
    %c0_26 = arith.constant 0 : index
    %34 = vector.load %arg1[%c4_24, %c0_25, %c0_26] : memref<9x8x4xf32, #tpu.memory_space<vmem>>, vector<1x8x4xf32>
    %35 = vector.shape_cast %34 : vector<1x8x4xf32> to vector<8x4xf32>
    %36 = vector.shape_cast %35 : vector<8x4xf32> to vector<1x8x4xf32>
    %37 = vector.broadcast %36 : vector<1x8x4xf32> to vector<2x8x4xf32>
    %38 = vector.extract_strided_slice %4 {offsets = [0, 0, 4], sizes = [2, 4, 128], strides = [1, 1, 1]} : vector<2x4x136xf32> to vector<2x4x128xf32>
    %cst_27 = arith.constant dense<0.000000e+00> : vector<2x8x128xf32>
    %39 = tpu.matmul %37, %38, %cst_27 {dimension_numbers = #tpu.dot_dimension_numbers<[2], [1], [1], [2], [0, 0, 0, 1, 1, 2], [0], [0]>} : vector<2x8x4xf32>, vector<2x4x128xf32>, vector<2x8x128xf32> -> vector<2x8x128xf32>
    %40 = arith.addf %33, %39 : vector<2x8x128xf32>
    %c5 = arith.constant 5 : index
    %c0_28 = arith.constant 0 : index
    %c0_29 = arith.constant 0 : index
    %41 = vector.load %arg1[%c5, %c0_28, %c0_29] : memref<9x8x4xf32, #tpu.memory_space<vmem>>, vector<1x8x4xf32>
    %42 = vector.shape_cast %41 : vector<1x8x4xf32> to vector<8x4xf32>
    %43 = vector.shape_cast %42 : vector<8x4xf32> to vector<1x8x4xf32>
    %44 = vector.broadcast %43 : vector<1x8x4xf32> to vector<2x8x4xf32>
    %45 = vector.extract_strided_slice %4 {offsets = [0, 0, 5], sizes = [2, 4, 128], strides = [1, 1, 1]} : vector<2x4x136xf32> to vector<2x4x128xf32>
    %cst_30 = arith.constant dense<0.000000e+00> : vector<2x8x128xf32>
    %46 = tpu.matmul %44, %45, %cst_30 {dimension_numbers = #tpu.dot_dimension_numbers<[2], [1], [1], [2], [0, 0, 0, 1, 1, 2], [0], [0]>} : vector<2x8x4xf32>, vector<2x4x128xf32>, vector<2x8x128xf32> -> vector<2x8x128xf32>
    %47 = arith.addf %40, %46 : vector<2x8x128xf32>
    %c6 = arith.constant 6 : index
    %c0_31 = arith.constant 0 : index
    %c0_32 = arith.constant 0 : index
    %48 = vector.load %arg1[%c6, %c0_31, %c0_32] : memref<9x8x4xf32, #tpu.memory_space<vmem>>, vector<1x8x4xf32>
    %49 = vector.shape_cast %48 : vector<1x8x4xf32> to vector<8x4xf32>
    %50 = vector.shape_cast %49 : vector<8x4xf32> to vector<1x8x4xf32>
    %51 = vector.broadcast %50 : vector<1x8x4xf32> to vector<2x8x4xf32>
    %52 = vector.extract_strided_slice %4 {offsets = [0, 0, 6], sizes = [2, 4, 128], strides = [1, 1, 1]} : vector<2x4x136xf32> to vector<2x4x128xf32>
    %cst_33 = arith.constant dense<0.000000e+00> : vector<2x8x128xf32>
    %53 = tpu.matmul %51, %52, %cst_33 {dimension_numbers = #tpu.dot_dimension_numbers<[2], [1], [1], [2], [0, 0, 0, 1, 1, 2], [0], [0]>} : vector<2x8x4xf32>, vector<2x4x128xf32>, vector<2x8x128xf32> -> vector<2x8x128xf32>
    %54 = arith.addf %47, %53 : vector<2x8x128xf32>
    %c7 = arith.constant 7 : index
    %c0_34 = arith.constant 0 : index
    %c0_35 = arith.constant 0 : index
    %55 = vector.load %arg1[%c7, %c0_34, %c0_35] : memref<9x8x4xf32, #tpu.memory_space<vmem>>, vector<1x8x4xf32>
    %56 = vector.shape_cast %55 : vector<1x8x4xf32> to vector<8x4xf32>
    %57 = vector.shape_cast %56 : vector<8x4xf32> to vector<1x8x4xf32>
    %58 = vector.broadcast %57 : vector<1x8x4xf32> to vector<2x8x4xf32>
    %59 = vector.extract_strided_slice %4 {offsets = [0, 0, 7], sizes = [2, 4, 128], strides = [1, 1, 1]} : vector<2x4x136xf32> to vector<2x4x128xf32>
    %cst_36 = arith.constant dense<0.000000e+00> : vector<2x8x128xf32>
    %60 = tpu.matmul %58, %59, %cst_36 {dimension_numbers = #tpu.dot_dimension_numbers<[2], [1], [1], [2], [0, 0, 0, 1, 1, 2], [0], [0]>} : vector<2x8x4xf32>, vector<2x4x128xf32>, vector<2x8x128xf32> -> vector<2x8x128xf32>
    %61 = arith.addf %54, %60 : vector<2x8x128xf32>
    %c8 = arith.constant 8 : index
    %c0_37 = arith.constant 0 : index
    %c0_38 = arith.constant 0 : index
    %62 = vector.load %arg1[%c8, %c0_37, %c0_38] : memref<9x8x4xf32, #tpu.memory_space<vmem>>, vector<1x8x4xf32>
    %63 = vector.shape_cast %62 : vector<1x8x4xf32> to vector<8x4xf32>
    %64 = vector.shape_cast %63 : vector<8x4xf32> to vector<1x8x4xf32>
    %65 = vector.broadcast %64 : vector<1x8x4xf32> to vector<2x8x4xf32>
    %66 = vector.extract_strided_slice %4 {offsets = [0, 0, 8], sizes = [2, 4, 128], strides = [1, 1, 1]} : vector<2x4x136xf32> to vector<2x4x128xf32>
    %cst_39 = arith.constant dense<0.000000e+00> : vector<2x8x128xf32>
    %67 = tpu.matmul %65, %66, %cst_39 {dimension_numbers = #tpu.dot_dimension_numbers<[2], [1], [1], [2], [0, 0, 0, 1, 1, 2], [0], [0]>} : vector<2x8x4xf32>, vector<2x4x128xf32>, vector<2x8x128xf32> -> vector<2x8x128xf32>
    %68 = arith.addf %61, %67 : vector<2x8x128xf32>
    %c0_40 = arith.constant 0 : index
    %c0_41 = arith.constant 0 : index
    %69 = vector.load %arg2[%c0_40, %c0_41] : memref<8x3xf32, #tpu.memory_space<vmem>>, vector<8x3xf32>
    %70 = vector.extract_strided_slice %69 {offsets = [0, 0], sizes = [8, 1], strides = [1, 1]} : vector<8x3xf32> to vector<8x1xf32>
    %71 = vector.shape_cast %70 : vector<8x1xf32> to vector<1x8x1xf32>
    %72 = vector.extract_strided_slice %69 {offsets = [0, 1], sizes = [8, 1], strides = [1, 1]} : vector<8x3xf32> to vector<8x1xf32>
    %73 = vector.shape_cast %72 : vector<8x1xf32> to vector<1x8x1xf32>
    %74 = vector.extract_strided_slice %69 {offsets = [0, 2], sizes = [8, 1], strides = [1, 1]} : vector<8x3xf32> to vector<8x1xf32>
    %75 = vector.shape_cast %74 : vector<8x1xf32> to vector<1x8x1xf32>
    %76 = vector.broadcast %71 : vector<1x8x1xf32> to vector<2x8x128xf32>
    %77 = arith.addf %68, %76 : vector<2x8x128xf32>
    %cst_42 = arith.constant dense<0.000000e+00> : vector<8x128xf32>
    %78 = vector.multi_reduction <add>, %77, %cst_42 [0] : vector<2x8x128xf32> to vector<8x128xf32>
    %79 = vector.shape_cast %78 : vector<8x128xf32> to vector<1x8x128xf32>
    %cst_43 = arith.constant dense<0.000000e+00> : vector<1x8xf32>
    %80 = vector.multi_reduction <add>, %79, %cst_43 [2] : vector<1x8x128xf32> to vector<1x8xf32>
    %81 = vector.shape_cast %80 : vector<1x8xf32> to vector<1x8x1xf32>
    %82 = arith.mulf %77, %77 : vector<2x8x128xf32>
    %cst_44 = arith.constant dense<0.000000e+00> : vector<8x128xf32>
    %83 = vector.multi_reduction <add>, %82, %cst_44 [0] : vector<2x8x128xf32> to vector<8x128xf32>
    %84 = vector.shape_cast %83 : vector<8x128xf32> to vector<1x8x128xf32>
    %cst_45 = arith.constant dense<0.000000e+00> : vector<1x8xf32>
    %85 = vector.multi_reduction <add>, %84, %cst_45 [2] : vector<1x8x128xf32> to vector<1x8xf32>
    %86 = vector.shape_cast %85 : vector<1x8xf32> to vector<1x8x1xf32>
    %cst_46 = arith.constant 3.906250e-03 : f32
    %87 = vector.broadcast %cst_46 : f32 to vector<1x8x1xf32>
    %88 = arith.mulf %81, %87 : vector<1x8x1xf32>
    %cst_47 = arith.constant 3.906250e-03 : f32
    %89 = vector.broadcast %cst_47 : f32 to vector<1x8x1xf32>
    %90 = arith.mulf %86, %89 : vector<1x8x1xf32>
    %91 = arith.mulf %88, %88 : vector<1x8x1xf32>
    %92 = arith.subf %90, %91 : vector<1x8x1xf32>
    %cst_48 = arith.constant 9.99999974E-6 : f32
    %93 = vector.broadcast %cst_48 : f32 to vector<1x8x1xf32>
    %94 = arith.addf %92, %93 : vector<1x8x1xf32>
    %95 = math.rsqrt %94 : vector<1x8x1xf32>
    %96 = arith.mulf %73, %95 : vector<1x8x1xf32>
    %97 = arith.mulf %88, %96 : vector<1x8x1xf32>
    %98 = arith.subf %75, %97 : vector<1x8x1xf32>
    %99 = vector.broadcast %96 : vector<1x8x1xf32> to vector<2x8x128xf32>
    %100 = arith.mulf %77, %99 : vector<2x8x128xf32>
    %101 = vector.broadcast %98 : vector<1x8x1xf32> to vector<2x8x128xf32>
    %102 = arith.addf %100, %101 : vector<2x8x128xf32>
    %cst_49 = arith.constant 0.000000e+00 : f32
    %103 = vector.broadcast %cst_49 : f32 to vector<2x8x128xf32>
    %104 = arith.maximumf %102, %103 : vector<2x8x128xf32>
    %cst_50 = arith.constant 0.000000e+00 : f32
    %105 = vector.broadcast %cst_50 : f32 to vector<2x8x136xf32>
    %c0_51 = arith.constant 0 : index
    %c0_52 = arith.constant 0 : index
    %c0_53 = arith.constant 0 : index
    %106 = vector.load %arg7[%c0_51, %c0_52, %c0_53] : memref<2x8x136xf32, #tpu.memory_space<vmem>>, vector<2x8x136xf32>
    tpu.vector_store %arg7[%c0_51, %c0_52, %c0_53], %105 {strides = array<i32>} : memref<2x8x136xf32, #tpu.memory_space<vmem>>, vector<2x8x136xf32>,
    %c0_54 = arith.constant 0 : index
    %c0_55 = arith.constant 0 : index
    %c4_56 = arith.constant 4 : index
    %107 = vector.load %arg7[%c0_54, %c0_55, %c4_56] : memref<2x8x136xf32, #tpu.memory_space<vmem>>, vector<2x8x128xf32>
    tpu.vector_store %arg7[%c0_54, %c0_55, %c4_56], %104 {strides = array<i32>} : memref<2x8x136xf32, #tpu.memory_space<vmem>>, vector<2x8x128xf32>,
    %c0_57 = arith.constant 0 : index
    %c0_58 = arith.constant 0 : index
    %c0_59 = arith.constant 0 : index
    %108 = vector.load %arg7[%c0_57, %c0_58, %c0_59] : memref<2x8x136xf32, #tpu.memory_space<vmem>>, vector<2x8x136xf32>
    %cst_60 = arith.constant 0.000000e+00 : f32
    %109 = vector.broadcast %cst_60 : f32 to vector<2x8x128xf32>
    %c0_61 = arith.constant 0 : index
    %c0_62 = arith.constant 0 : index
    %c0_63 = arith.constant 0 : index
    %110 = vector.load %arg3[%c0_61, %c0_62, %c0_63] : memref<9x8x8xf32, #tpu.memory_space<vmem>>, vector<1x8x8xf32>
    %111 = vector.shape_cast %110 : vector<1x8x8xf32> to vector<8x8xf32>
    %112 = vector.shape_cast %111 : vector<8x8xf32> to vector<1x8x8xf32>
    %113 = vector.broadcast %112 : vector<1x8x8xf32> to vector<2x8x8xf32>
    %114 = vector.extract_strided_slice %108 {offsets = [0, 0, 0], sizes = [2, 8, 128], strides = [1, 1, 1]} : vector<2x8x136xf32> to vector<2x8x128xf32>
    %cst_64 = arith.constant dense<0.000000e+00> : vector<2x8x128xf32>
    %115 = tpu.matmul %113, %114, %cst_64 {dimension_numbers = #tpu.dot_dimension_numbers<[2], [1], [1], [2], [0, 0, 0, 1, 1, 2], [0], [0]>} : vector<2x8x8xf32>, vector<2x8x128xf32>, vector<2x8x128xf32> -> vector<2x8x128xf32>
    %116 = arith.addf %109, %115 : vector<2x8x128xf32>
    %c1_65 = arith.constant 1 : index
    %c0_66 = arith.constant 0 : index
    %c0_67 = arith.constant 0 : index
    %117 = vector.load %arg3[%c1_65, %c0_66, %c0_67] : memref<9x8x8xf32, #tpu.memory_space<vmem>>, vector<1x8x8xf32>
    %118 = vector.shape_cast %117 : vector<1x8x8xf32> to vector<8x8xf32>
    %119 = vector.shape_cast %118 : vector<8x8xf32> to vector<1x8x8xf32>
    %120 = vector.broadcast %119 : vector<1x8x8xf32> to vector<2x8x8xf32>
    %121 = vector.extract_strided_slice %108 {offsets = [0, 0, 1], sizes = [2, 8, 128], strides = [1, 1, 1]} : vector<2x8x136xf32> to vector<2x8x128xf32>
    %cst_68 = arith.constant dense<0.000000e+00> : vector<2x8x128xf32>
    %122 = tpu.matmul %120, %121, %cst_68 {dimension_numbers = #tpu.dot_dimension_numbers<[2], [1], [1], [2], [0, 0, 0, 1, 1, 2], [0], [0]>} : vector<2x8x8xf32>, vector<2x8x128xf32>, vector<2x8x128xf32> -> vector<2x8x128xf32>
    %123 = arith.addf %116, %122 : vector<2x8x128xf32>
    %c2_69 = arith.constant 2 : index
    %c0_70 = arith.constant 0 : index
    %c0_71 = arith.constant 0 : index
    %124 = vector.load %arg3[%c2_69, %c0_70, %c0_71] : memref<9x8x8xf32, #tpu.memory_space<vmem>>, vector<1x8x8xf32>
    %125 = vector.shape_cast %124 : vector<1x8x8xf32> to vector<8x8xf32>
    %126 = vector.shape_cast %125 : vector<8x8xf32> to vector<1x8x8xf32>
    %127 = vector.broadcast %126 : vector<1x8x8xf32> to vector<2x8x8xf32>
    %128 = vector.extract_strided_slice %108 {offsets = [0, 0, 2], sizes = [2, 8, 128], strides = [1, 1, 1]} : vector<2x8x136xf32> to vector<2x8x128xf32>
    %cst_72 = arith.constant dense<0.000000e+00> : vector<2x8x128xf32>
    %129 = tpu.matmul %127, %128, %cst_72 {dimension_numbers = #tpu.dot_dimension_numbers<[2], [1], [1], [2], [0, 0, 0, 1, 1, 2], [0], [0]>} : vector<2x8x8xf32>, vector<2x8x128xf32>, vector<2x8x128xf32> -> vector<2x8x128xf32>
    %130 = arith.addf %123, %129 : vector<2x8x128xf32>
    %c3_73 = arith.constant 3 : index
    %c0_74 = arith.constant 0 : index
    %c0_75 = arith.constant 0 : index
    %131 = vector.load %arg3[%c3_73, %c0_74, %c0_75] : memref<9x8x8xf32, #tpu.memory_space<vmem>>, vector<1x8x8xf32>
    %132 = vector.shape_cast %131 : vector<1x8x8xf32> to vector<8x8xf32>
    %133 = vector.shape_cast %132 : vector<8x8xf32> to vector<1x8x8xf32>
    %134 = vector.broadcast %133 : vector<1x8x8xf32> to vector<2x8x8xf32>
    %135 = vector.extract_strided_slice %108 {offsets = [0, 0, 3], sizes = [2, 8, 128], strides = [1, 1, 1]} : vector<2x8x136xf32> to vector<2x8x128xf32>
    %cst_76 = arith.constant dense<0.000000e+00> : vector<2x8x128xf32>
    %136 = tpu.matmul %134, %135, %cst_76 {dimension_numbers = #tpu.dot_dimension_numbers<[2], [1], [1], [2], [0, 0, 0, 1, 1, 2], [0], [0]>} : vector<2x8x8xf32>, vector<2x8x128xf32>, vector<2x8x128xf32> -> vector<2x8x128xf32>
    %137 = arith.addf %130, %136 : vector<2x8x128xf32>
    %c4_77 = arith.constant 4 : index
    %c0_78 = arith.constant 0 : index
    %c0_79 = arith.constant 0 : index
    %138 = vector.load %arg3[%c4_77, %c0_78, %c0_79] : memref<9x8x8xf32, #tpu.memory_space<vmem>>, vector<1x8x8xf32>
    %139 = vector.shape_cast %138 : vector<1x8x8xf32> to vector<8x8xf32>
    %140 = vector.shape_cast %139 : vector<8x8xf32> to vector<1x8x8xf32>
    %141 = vector.broadcast %140 : vector<1x8x8xf32> to vector<2x8x8xf32>
    %142 = vector.extract_strided_slice %108 {offsets = [0, 0, 4], sizes = [2, 8, 128], strides = [1, 1, 1]} : vector<2x8x136xf32> to vector<2x8x128xf32>
    %cst_80 = arith.constant dense<0.000000e+00> : vector<2x8x128xf32>
    %143 = tpu.matmul %141, %142, %cst_80 {dimension_numbers = #tpu.dot_dimension_numbers<[2], [1], [1], [2], [0, 0, 0, 1, 1, 2], [0], [0]>} : vector<2x8x8xf32>, vector<2x8x128xf32>, vector<2x8x128xf32> -> vector<2x8x128xf32>
    %144 = arith.addf %137, %143 : vector<2x8x128xf32>
    %c5_81 = arith.constant 5 : index
    %c0_82 = arith.constant 0 : index
    %c0_83 = arith.constant 0 : index
    %145 = vector.load %arg3[%c5_81, %c0_82, %c0_83] : memref<9x8x8xf32, #tpu.memory_space<vmem>>, vector<1x8x8xf32>
    %146 = vector.shape_cast %145 : vector<1x8x8xf32> to vector<8x8xf32>
    %147 = vector.shape_cast %146 : vector<8x8xf32> to vector<1x8x8xf32>
    %148 = vector.broadcast %147 : vector<1x8x8xf32> to vector<2x8x8xf32>
    %149 = vector.extract_strided_slice %108 {offsets = [0, 0, 5], sizes = [2, 8, 128], strides = [1, 1, 1]} : vector<2x8x136xf32> to vector<2x8x128xf32>
    %cst_84 = arith.constant dense<0.000000e+00> : vector<2x8x128xf32>
    %150 = tpu.matmul %148, %149, %cst_84 {dimension_numbers = #tpu.dot_dimension_numbers<[2], [1], [1], [2], [0, 0, 0, 1, 1, 2], [0], [0]>} : vector<2x8x8xf32>, vector<2x8x128xf32>, vector<2x8x128xf32> -> vector<2x8x128xf32>
    %151 = arith.addf %144, %150 : vector<2x8x128xf32>
    %c6_85 = arith.constant 6 : index
    %c0_86 = arith.constant 0 : index
    %c0_87 = arith.constant 0 : index
    %152 = vector.load %arg3[%c6_85, %c0_86, %c0_87] : memref<9x8x8xf32, #tpu.memory_space<vmem>>, vector<1x8x8xf32>
    %153 = vector.shape_cast %152 : vector<1x8x8xf32> to vector<8x8xf32>
    %154 = vector.shape_cast %153 : vector<8x8xf32> to vector<1x8x8xf32>
    %155 = vector.broadcast %154 : vector<1x8x8xf32> to vector<2x8x8xf32>
    %156 = vector.extract_strided_slice %108 {offsets = [0, 0, 6], sizes = [2, 8, 128], strides = [1, 1, 1]} : vector<2x8x136xf32> to vector<2x8x128xf32>
    %cst_88 = arith.constant dense<0.000000e+00> : vector<2x8x128xf32>
    %157 = tpu.matmul %155, %156, %cst_88 {dimension_numbers = #tpu.dot_dimension_numbers<[2], [1], [1], [2], [0, 0, 0, 1, 1, 2], [0], [0]>} : vector<2x8x8xf32>, vector<2x8x128xf32>, vector<2x8x128xf32> -> vector<2x8x128xf32>
    %158 = arith.addf %151, %157 : vector<2x8x128xf32>
    %c7_89 = arith.constant 7 : index
    %c0_90 = arith.constant 0 : index
    %c0_91 = arith.constant 0 : index
    %159 = vector.load %arg3[%c7_89, %c0_90, %c0_91] : memref<9x8x8xf32, #tpu.memory_space<vmem>>, vector<1x8x8xf32>
    %160 = vector.shape_cast %159 : vector<1x8x8xf32> to vector<8x8xf32>
    %161 = vector.shape_cast %160 : vector<8x8xf32> to vector<1x8x8xf32>
    %162 = vector.broadcast %161 : vector<1x8x8xf32> to vector<2x8x8xf32>
    %163 = vector.extract_strided_slice %108 {offsets = [0, 0, 7], sizes = [2, 8, 128], strides = [1, 1, 1]} : vector<2x8x136xf32> to vector<2x8x128xf32>
    %cst_92 = arith.constant dense<0.000000e+00> : vector<2x8x128xf32>
    %164 = tpu.matmul %162, %163, %cst_92 {dimension_numbers = #tpu.dot_dimension_numbers<[2], [1], [1], [2], [0, 0, 0, 1, 1, 2], [0], [0]>} : vector<2x8x8xf32>, vector<2x8x128xf32>, vector<2x8x128xf32> -> vector<2x8x128xf32>
    %165 = arith.addf %158, %164 : vector<2x8x128xf32>
    %c8_93 = arith.constant 8 : index
    %c0_94 = arith.constant 0 : index
    %c0_95 = arith.constant 0 : index
    %166 = vector.load %arg3[%c8_93, %c0_94, %c0_95] : memref<9x8x8xf32, #tpu.memory_space<vmem>>, vector<1x8x8xf32>
    %167 = vector.shape_cast %166 : vector<1x8x8xf32> to vector<8x8xf32>
    %168 = vector.shape_cast %167 : vector<8x8xf32> to vector<1x8x8xf32>
    %169 = vector.broadcast %168 : vector<1x8x8xf32> to vector<2x8x8xf32>
    %170 = vector.extract_strided_slice %108 {offsets = [0, 0, 8], sizes = [2, 8, 128], strides = [1, 1, 1]} : vector<2x8x136xf32> to vector<2x8x128xf32>
    %cst_96 = arith.constant dense<0.000000e+00> : vector<2x8x128xf32>
    %171 = tpu.matmul %169, %170, %cst_96 {dimension_numbers = #tpu.dot_dimension_numbers<[2], [1], [1], [2], [0, 0, 0, 1, 1, 2], [0], [0]>} : vector<2x8x8xf32>, vector<2x8x128xf32>, vector<2x8x128xf32> -> vector<2x8x128xf32>
    %172 = arith.addf %165, %171 : vector<2x8x128xf32>
    %c0_97 = arith.constant 0 : index
    %c0_98 = arith.constant 0 : index
    %173 = vector.load %arg4[%c0_97, %c0_98] : memref<8x3xf32, #tpu.memory_space<vmem>>, vector<8x3xf32>
    %174 = vector.extract_strided_slice %173 {offsets = [0, 0], sizes = [8, 1], strides = [1, 1]} : vector<8x3xf32> to vector<8x1xf32>
    %175 = vector.shape_cast %174 : vector<8x1xf32> to vector<1x8x1xf32>
    %176 = vector.extract_strided_slice %173 {offsets = [0, 1], sizes = [8, 1], strides = [1, 1]} : vector<8x3xf32> to vector<8x1xf32>
    %177 = vector.shape_cast %176 : vector<8x1xf32> to vector<1x8x1xf32>
    %178 = vector.extract_strided_slice %173 {offsets = [0, 2], sizes = [8, 1], strides = [1, 1]} : vector<8x3xf32> to vector<8x1xf32>
    %179 = vector.shape_cast %178 : vector<8x1xf32> to vector<1x8x1xf32>
    %180 = vector.broadcast %175 : vector<1x8x1xf32> to vector<2x8x128xf32>
    %181 = arith.addf %172, %180 : vector<2x8x128xf32>
    %cst_99 = arith.constant dense<0.000000e+00> : vector<8x128xf32>
    %182 = vector.multi_reduction <add>, %181, %cst_99 [0] : vector<2x8x128xf32> to vector<8x128xf32>
    %183 = vector.shape_cast %182 : vector<8x128xf32> to vector<1x8x128xf32>
    %cst_100 = arith.constant dense<0.000000e+00> : vector<1x8xf32>
    %184 = vector.multi_reduction <add>, %183, %cst_100 [2] : vector<1x8x128xf32> to vector<1x8xf32>
    %185 = vector.shape_cast %184 : vector<1x8xf32> to vector<1x8x1xf32>
    %186 = arith.mulf %181, %181 : vector<2x8x128xf32>
    %cst_101 = arith.constant dense<0.000000e+00> : vector<8x128xf32>
    %187 = vector.multi_reduction <add>, %186, %cst_101 [0] : vector<2x8x128xf32> to vector<8x128xf32>
    %188 = vector.shape_cast %187 : vector<8x128xf32> to vector<1x8x128xf32>
    %cst_102 = arith.constant dense<0.000000e+00> : vector<1x8xf32>
    %189 = vector.multi_reduction <add>, %188, %cst_102 [2] : vector<1x8x128xf32> to vector<1x8xf32>
    %190 = vector.shape_cast %189 : vector<1x8xf32> to vector<1x8x1xf32>
    %cst_103 = arith.constant 3.906250e-03 : f32
    %191 = vector.broadcast %cst_103 : f32 to vector<1x8x1xf32>
    %192 = arith.mulf %185, %191 : vector<1x8x1xf32>
    %cst_104 = arith.constant 3.906250e-03 : f32
    %193 = vector.broadcast %cst_104 : f32 to vector<1x8x1xf32>
    %194 = arith.mulf %190, %193 : vector<1x8x1xf32>
    %195 = arith.mulf %192, %192 : vector<1x8x1xf32>
    %196 = arith.subf %194, %195 : vector<1x8x1xf32>
    %cst_105 = arith.constant 9.99999974E-6 : f32
    %197 = vector.broadcast %cst_105 : f32 to vector<1x8x1xf32>
    %198 = arith.addf %196, %197 : vector<1x8x1xf32>
    %199 = math.rsqrt %198 : vector<1x8x1xf32>
    %200 = arith.mulf %177, %199 : vector<1x8x1xf32>
    %201 = arith.mulf %192, %200 : vector<1x8x1xf32>
    %202 = arith.subf %179, %201 : vector<1x8x1xf32>
    %203 = vector.broadcast %200 : vector<1x8x1xf32> to vector<2x8x128xf32>
    %204 = arith.mulf %181, %203 : vector<2x8x128xf32>
    %205 = vector.broadcast %202 : vector<1x8x1xf32> to vector<2x8x128xf32>
    %206 = arith.addf %204, %205 : vector<2x8x128xf32>
    %cst_106 = arith.constant 0.000000e+00 : f32
    %207 = vector.broadcast %cst_106 : f32 to vector<2x8x128xf32>
    %208 = arith.maximumf %206, %207 : vector<2x8x128xf32>
    %c0_107 = arith.constant 0 : index
    %c0_108 = arith.constant 0 : index
    %c0_109 = arith.constant 0 : index
    %209 = vector.load %arg5[%c0_107, %c0_108, %c0_109] : memref<2x8x128xf32, #tpu.memory_space<vmem>>, vector<2x8x128xf32>
    tpu.vector_store %arg5[%c0_107, %c0_108, %c0_109], %208 {strides = array<i32>} : memref<2x8x128xf32, #tpu.memory_space<vmem>>, vector<2x8x128xf32>,
    return
  }
}

</mosaic_0001>

<bundles_post_ra>
// kernel: tpu_custom_call.1
= control target key start
LH: loop header
LB: loop body
LE: loop exit
PB: predicated region body
PF: predicated region fallthrough
CT: control target
= control target key end

     0   :  { %vm23_vm0 = vcmask 1043456   ;;  %s1512_s20 = smov 4   ;;  %vm24_vm1 = vcmask 64516   ;;  %s1820_s0 = inlined_call_operand.vmem [shape: f32[2,4,128], index: 0, kind: input, shape index: {}]   ;;  %s1821_s1 = inlined_call_operand.vmem [shape: f32[9,8,4], index: 1, kind: input, shape index: {}]   ;;  %s1822_s2 = inlined_call_operand.vmem [shape: f32[8,3], index: 2, kind: input, shape index: {}]   ;;  %s1823_s3 = inlined_call_operand.vmem [shape: f32[9,8,8], index: 3, kind: input, shape index: {}]   ;;  %s1824_s4 = inlined_call_operand.vmem [shape: f32[8,3], index: 4, kind: input, shape index: {}]   ;;  %s1825_s5 = inlined_call_operand.hbm [shape: f32[2,8,128], index: 5, kind: output, shape index: {}]  }
   0x1   :  { %v21_v0 = vld [vmem:[%s1820_s0] sm:$0xf] }
   0x2   :  { %30 = vrot.lane.b32.xlu0 %v21_v0, %s1512_s20 }
   0x3   :  { %10 = vsyncpa [#allocation5], 0  ;;  %v1513_v1 = vmov 0.0   ;;  %v22_v2 = vld [vmem:[%s1820_s0 + $0x4] sm:$0xf]  ;;  %vm41_vm3 = vcmask 1043488  }
   0x4   :  { %vm25_vm2 = vmor %vm24_vm1, %vm23_vm0  ;;  %694 = vst [vmem:[#allocation3] sm:$0xff] %v1513_v1  ;;  %vm42_vm4 = vcmask 31748   ;;  %vm36_vm5 = vcmask 31744   ;;  %s1514_s0 = smov 127   ;;  %s1515_s23 = smov 126   ;;  %vm59_vm7 = vcmask 1039360  }
   0x5   :  { %26 = vst.msk [vmem:[#allocation2] sm:$0xff] %vm25_vm2, %v1513_v1  ;;  %vm43_vm6 = vmor %vm42_vm4, %vm41_vm3  ;;  %s1516_s24 = smov 125   ;;  %s1517_s25 = smov 124   ;;  %vm173_vm8 = vcmask 1031168   ;;  %v1308_v51 = vld [vmem:[%s1821_s1 + $0x8] sm:$0xff]  ;;  %vm241_vm9 = vcmask 1022976  }
   0x6   :  { %27 = vst.msk [vmem:[#allocation2 + $0x8] sm:$0xff] %vm25_vm2, %v1513_v1  ;;  %s1518_s26 = smov 123   ;;  %s1519_s27 = smov 122   ;;  %v48_v59 = vld [vmem:[%s1821_s1] sm:$0xff]  ;;  %vm309_vm10 = vcmask 1014784   ;;  %vm377_vm11 = vcmask 1006592  }
   0x7   :  { %697 = vst [vmem:[#allocation3 + $0x10] sm:$0xff] %v1513_v1  ;;  %s1520_s28 = smov 121   ;;  %s1521_s29 = smov 120   ;;  %vm445_vm12 = vcmask 998400   ;;  %vm513_vm13 = vcmask 990208   ;;  %vm581_vm14 = vcmask 982016  }
   0x8   :  { %vm695_vm2 = vcmask 64512   ;;  %vm707_vm3 = vcmask 1047584   ;;  %s1296_s21 = sshll.u32 %s1825_s5, 4  ;;  %s1527_s22 = smov 128   ;;  %s1297_s21 = int_to_ptr.hbm [resolvable:$true] %s1296_s21 }
   0x9   :  { %696 = vst.msk [vmem:[#allocation3 + $0x8] sm:$0xff] %vm695_vm2, %v1513_v1  ;;  %s1528_s30 = smov 8  }
   0xa   :  { %32 = vrot.lane.b32.xlu0 %v22_v2, %s1512_s20  ;;  %698 = vst.msk [vmem:[#allocation3 + $0x18] sm:$0xff] %vm695_vm2, %v1513_v1 }
  0x74   :  { %v31_v3 = vpop.permute.xlu0 %30 }
  0x75   :  { %v34_v4 = vrot.slane %v31_v3, 4 }
  0x77   :  { %v37_v5 = vsel %vm36_vm5, %v34_v4, %v31_v3  ;;  %v1317_v3 = vld [vmem:[%s1821_s1 + $0x10] sm:$0xff]  ;;  %v1322_v4 = vld [vmem:[%s1821_s1 + $0x18] sm:$0xff] }
  0x78   :  { %44 = vst.msk [vmem:[#allocation2] sm:$0xff] %vm43_vm6, %v37_v5 }
  0x7c   :  { %v33_v6 = vpop.permute.xlu0 %32 }
  0x7d   :  { %v35_v7 = vrot.slane %v33_v6, 4 }
  0x7f   :  { %v38_v8 = vsel %vm36_vm5, %v35_v7, %v33_v6  ;;  %v1574_v9 = vld [vmem:[#allocation2] sm:$0xff] }
  0x80   :  { %45 = vst.msk [vmem:[#allocation2 + $0x8] sm:$0xff] %vm43_vm6, %v38_v8  ;;  %1313 = vmatpush.msk.msra.mxu2 %vm23_vm0, %v1574_v9  ;;  %v1327_v8 = vld [vmem:[%s1821_s1 + $0x20] sm:$0xff] }
  0x81   :  { %52 = vst [vmem:[#allocation1] ss:$2 sm:$0xff] %v1574_v9  ;;  %1314 = vmatmul.msk.f32.vlgmr.msra.gmra.mxu2 %vm36_vm5, %v48_v59 }
  0x87   :  { %v1579_v10 = vld [vmem:[#allocation2 + $0x8] sm:$0xff] }
  0x88   :  { %v54_v11 = vld.sshfl [vmem:[#allocation1 + $0x8] sm:$0xff pattern:$0x75316420]  ;;  %v53_v12 = vld.sshfl [vmem:[#allocation1] sm:$0xff pattern:$0x75316420]  ;;  %1315 = vmatpush.msk.msra.mxu3 %vm23_vm0, %v1579_v10 }
  0x89   :  { %55 = vrot.lane.b32.xlu1 %v53_v12, %s1514_s0  ;;  %87 = vst [vmem:[#allocation1] ss:$2 sm:$0xff] %v1579_v10  ;;  %1316 = vmatmul.msk.f32.vlgmr.msra.gmra.mxu3 %vm36_vm5, %v48_v59 }
  0x90   :  { %v88_v13 = vld.sshfl [vmem:[#allocation1] sm:$0xff pattern:$0x75316420]  ;;  %v89_v14 = vld.sshfl [vmem:[#allocation1 + $0x8] sm:$0xff pattern:$0x75316420] }
  0x91   :  { %166 = vst [vmem:[#allocation1] ss:$2 sm:$0xff] %v1574_v9  ;;  %57 = vrot.lane.b32.xlu1 %v54_v11, %s1514_s0  ;;  %90 = vrot.lane.b32.xlu2 %v88_v13, %s1514_s0  ;;  %v1332_v11 = vld [vmem:[%s1821_s1 + $0x28] sm:$0xff] }
  0x98   :  { %v167_v15 = vld.sshfl [vmem:[#allocation1] sm:$0xff pattern:$0x75316420]  ;;  %v168_v16 = vld.sshfl [vmem:[#allocation1 + $0x8] sm:$0xff pattern:$0x75316420] }
  0x99   :  { %200 = vst [vmem:[#allocation1] ss:$2 sm:$0xff] %v1579_v10  ;;  %92 = vrot.lane.b32.xlu2 %v89_v14, %s1514_s0  ;;  %171 = vrot.lane.b32.xlu1 %v168_v16, %s1515_s23 }
  0x9a   :  { %169 = vrot.lane.b32.xlu0 %v167_v15, %s1515_s23 }
  0xa0   :  { %v202_v17 = vld.sshfl [vmem:[#allocation1 + $0x8] sm:$0xff pattern:$0x75316420]  ;;  %v201_v18 = vld.sshfl [vmem:[#allocation1] sm:$0xff pattern:$0x75316420] }
  0xa1   :  { %203 = vrot.lane.b32.xlu2 %v201_v18, %s1515_s23  ;;  %234 = vst [vmem:[#allocation1] ss:$2 sm:$0xff] %v1574_v9  ;;  %v1337_v18 = vld [vmem:[%s1821_s1 + $0x30] sm:$0xff] }
  0xa2   :  { %205 = vrot.lane.b32.xlu0 %v202_v17, %s1515_s23 }
  0xa8   :  { %v236_v19 = vld.sshfl [vmem:[#allocation1 + $0x8] sm:$0xff pattern:$0x75316420]  ;;  %v235_v20 = vld.sshfl [vmem:[#allocation1] sm:$0xff pattern:$0x75316420] }
  0xa9   :  { %239 = vrot.lane.b32.xlu2 %v236_v19, %s1516_s24  ;;  %237 = vrot.lane.b32.xlu1 %v235_v20, %s1516_s24  ;;  %268 = vst [vmem:[#allocation1] ss:$2 sm:$0xff] %v1579_v10 }
  0xb0   :  { %v270_v21 = vld.sshfl [vmem:[#allocation1 + $0x8] sm:$0xff pattern:$0x75316420]  ;;  %v269_v22 = vld.sshfl [vmem:[#allocation1] sm:$0xff pattern:$0x75316420] }
  0xb1   :  { %273 = vrot.lane.b32.xlu1 %v270_v21, %s1516_s24  ;;  %271 = vrot.lane.b32.xlu0 %v269_v22, %s1516_s24  ;;  %302 = vst [vmem:[#allocation1] ss:$2 sm:$0xff] %v1574_v9 }
  0xb8   :  { %v304_v23 = vld.sshfl [vmem:[#allocation1 + $0x8] sm:$0xff pattern:$0x75316420]  ;;  %v303_v24 = vld.sshfl [vmem:[#allocation1] sm:$0xff pattern:$0x75316420] }
  0xb9   :  { %307 = vrot.lane.b32.xlu0 %v304_v23, %s1517_s25  ;;  %305 = vrot.lane.b32.xlu2 %v303_v24, %s1517_s25  ;;  %336 = vst [vmem:[#allocation1] ss:$2 sm:$0xff] %v1579_v10  ;;  %v1692_v23 = vld [vmem:[%s1822_s2] sm:$0xff]  ;;  %v1522_v24 = vmov 0  }
  0xba   :  { %1395 = vset.pattern.permute.xlu1 %v1522_v24 }
  0xc0   :  { %v338_v25 = vld.sshfl [vmem:[#allocation1 + $0x8] sm:$0xff pattern:$0x75316420]  ;;  %v337_v26 = vld.sshfl [vmem:[#allocation1] sm:$0xff pattern:$0x75316420] }
  0xc1   :  { %341 = vrot.lane.b32.xlu2 %v338_v25, %s1517_s25  ;;  %339 = vrot.lane.b32.xlu1 %v337_v26, %s1517_s25  ;;  %370 = vst [vmem:[#allocation1] ss:$2 sm:$0xff] %v1574_v9 }
  0xc8   :  { %v372_v27 = vld.sshfl [vmem:[#allocation1 + $0x8] sm:$0xff pattern:$0x75316420]  ;;  %v371_v28 = vld.sshfl [vmem:[#allocation1] sm:$0xff pattern:$0x75316420] }
  0xc9   :  { %375 = vrot.lane.b32.xlu1 %v372_v27, %s1518_s26  ;;  %373 = vrot.lane.b32.xlu0 %v371_v28, %s1518_s26  ;;  %404 = vst [vmem:[#allocation1] ss:$2 sm:$0xff] %v1579_v10  ;;  %v1342_v27 = vld [vmem:[%s1821_s1 + $0x38] sm:$0xff] }
  0xd0   :  { %v406_v29 = vld.sshfl [vmem:[#allocation1 + $0x8] sm:$0xff pattern:$0x75316420]  ;;  %v405_v30 = vld.sshfl [vmem:[#allocation1] sm:$0xff pattern:$0x75316420] }
  0xd1   :  { %409 = vrot.lane.b32.xlu0 %v406_v29, %s1518_s26  ;;  %407 = vrot.lane.b32.xlu2 %v405_v30, %s1518_s26  ;;  %438 = vst [vmem:[#allocation1] ss:$2 sm:$0xff] %v1574_v9 }
  0xd8   :  { %v440_v31 = vld.sshfl [vmem:[#allocation1 + $0x8] sm:$0xff pattern:$0x75316420]  ;;  %v439_v32 = vld.sshfl [vmem:[#allocation1] sm:$0xff pattern:$0x75316420] }
  0xd9   :  { %443 = vrot.lane.b32.xlu2 %v440_v31, %s1519_s27  ;;  %441 = vrot.lane.b32.xlu1 %v439_v32, %s1519_s27  ;;  %472 = vst [vmem:[#allocation1] ss:$2 sm:$0xff] %v1579_v10 }
  0xe0   :  { %v474_v33 = vld.sshfl [vmem:[#allocation1 + $0x8] sm:$0xff pattern:$0x75316420]  ;;  %v473_v34 = vld.sshfl [vmem:[#allocation1] sm:$0xff pattern:$0x75316420] }
  0xe1   :  { %477 = vrot.lane.b32.xlu1 %v474_v33, %s1519_s27  ;;  %475 = vrot.lane.b32.xlu0 %v473_v34, %s1519_s27  ;;  %506 = vst [vmem:[#allocation1] ss:$2 sm:$0xff] %v1574_v9  ;;  %v1347_v34 = vld [vmem:[%s1821_s1 + $0x40] sm:$0xff]  ;;  %s1524_s1 = smov 1  }
  0xe8   :  { %v508_v35 = vld.sshfl [vmem:[#allocation1 + $0x8] sm:$0xff pattern:$0x75316420]  ;;  %v507_v36 = vld.sshfl [vmem:[#allocation1] sm:$0xff pattern:$0x75316420] }
  0xe9   :  { %511 = vrot.lane.b32.xlu0 %v508_v35, %s1520_s28  ;;  %509 = vrot.lane.b32.xlu2 %v507_v36, %s1520_s28  ;;  %540 = vst [vmem:[#allocation1] ss:$2 sm:$0xff] %v1579_v10 }
  0xeb   :  { %v91_v37 = vpop.permute.xlu2 %90 }
  0xf0   :  { %v542_v38 = vld.sshfl [vmem:[#allocation1 + $0x8] sm:$0xff pattern:$0x75316420]  ;;  %v541_v39 = vld.sshfl [vmem:[#allocation1] sm:$0xff pattern:$0x75316420] }
  0xf1   :  { %545 = vrot.lane.b32.xlu2 %v542_v38, %s1520_s28  ;;  %543 = vrot.lane.b32.xlu1 %v541_v39, %s1520_s28  ;;  %574 = vst [vmem:[#allocation1] ss:$2 sm:$0xff] %v1574_v9 }
  0xf3   :  { %v93_v40 = vpop.permute.xlu2 %92 }
  0xf4   :  { %v94_v41 = vsel %vm59_vm7, %v91_v37, %v93_v40 }
  0xf5   :  { %1311 = vmatpush.msk.msra.mxu1 %vm23_vm0, %v94_v41 }
  0xf6   :  { %1312 = vmatmul.msk.f32.vlgmr.msra.gmra.mxu1 %vm36_vm5, %v1308_v51 }
  0xf8   :  { %v576_v42 = vld.sshfl [vmem:[#allocation1 + $0x8] sm:$0xff pattern:$0x75316420]  ;;  %v575_v43 = vld.sshfl [vmem:[#allocation1] sm:$0xff pattern:$0x75316420] }
  0xf9   :  { %579 = vrot.lane.b32.xlu1 %v576_v42, %s1521_s29  ;;  %577 = vrot.lane.b32.xlu0 %v575_v43, %s1521_s29  ;;  %608 = vst [vmem:[#allocation1] ss:$2 sm:$0xff] %v1579_v10 }
  0xfb   :  { %v56_v44 = vpop.permute.xlu1 %55  ;;  %v204_v53 = vpop.permute.xlu2 %203 }
 0x100   :  { %v610_v45 = vld.sshfl [vmem:[#allocation1 + $0x8] sm:$0xff pattern:$0x75316420]  ;;  %v609_v46 = vld.sshfl [vmem:[#allocation1] sm:$0xff pattern:$0x75316420] }
 0x101   :  { %613 = vrot.lane.b32.xlu0 %v610_v45, %s1521_s29  ;;  %611 = vrot.lane.b32.xlu2 %v609_v46, %s1521_s29 }
 0x102   :  { %643 = vperm.xlu1 %1395, %v1692_v23  }
 0x103   :  { %v58_v47 = vpop.permute.xlu1 %57  ;;  %v240_v56 = vpop.permute.xlu2 %239 }
 0x104   :  { %v60_v48 = vsel %vm59_vm7, %v56_v44, %v58_v47  ;;  %v139_v41 = vpop.f32.mrf.mxu2 }
 0x105   :  { %1309 = vmatpush.msk.msra.mxu0 %vm23_vm0, %v60_v48 }
 0x106   :  { %1310 = vmatmul.msk.f32.vlgmr.msra.gmra.mxu0 %vm36_vm5, %v1308_v51 }
 0x10b   :  { %v172_v49 = vpop.permute.xlu1 %171 }
 0x10c   :  { %v170_v50 = vpop.permute.xlu0 %169  ;;  %v161_v43 = vpop.f32.mrf.mxu3 }
 0x10d   :  { %v174_v52 = vsel %vm173_vm8, %v170_v50, %v172_v49 }
 0x10e   :  { %1318 = vmatpush.msk.msrb.mxu0 %vm23_vm0, %v174_v52 }
 0x10f   :  { %1319 = vmatmul.msk.f32.vlgmr.msrb.gmra.mxu0 %vm36_vm5, %v1317_v3 }
 0x113   :  { %v306_v63 = vpop.permute.xlu2 %305 }
 0x114   :  { %v206_v54 = vpop.permute.xlu0 %205 }
 0x115   :  { %v207_v55 = vsel %vm173_vm8, %v204_v53, %v206_v54 }
 0x116   :  { %1320 = vmatpush.msk.msrb.mxu1 %vm23_vm0, %v207_v55 }
 0x117   :  { %1321 = vmatmul.msk.f32.vlgmr.msrb.gmra.mxu1 %vm36_vm5, %v1317_v3 }
 0x11b   :  { %v238_v57 = vpop.permute.xlu1 %237  ;;  %v342_v5 = vpop.permute.xlu2 %341 }
 0x11c   :  { %v242_v58 = vsel %vm241_vm9, %v238_v57, %v240_v56 }
 0x11d   :  { %1323 = vmatpush.msk.msrb.mxu2 %vm23_vm0, %v242_v58 }
 0x11e   :  { %1324 = vmatmul.msk.f32.vlgmr.msrb.gmra.mxu2 %vm36_vm5, %v1322_v4 }
 0x123   :  { %v274_v60 = vpop.permute.xlu1 %273  ;;  %v272_v61 = vpop.permute.xlu0 %271 }
 0x124   :  { %v275_v62 = vsel %vm241_vm9, %v272_v61, %v274_v60 }
 0x125   :  { %1325 = vmatpush.msk.msrb.mxu3 %vm23_vm0, %v275_v62 }
 0x126   :  { %1326 = vmatmul.msk.f32.vlgmr.msrb.gmra.mxu3 %vm36_vm5, %v1322_v4 }
 0x12b   :  { %v308_v0 = vpop.permute.xlu0 %307  ;;  %v408_v13 = vpop.permute.xlu2 %407 }
 0x12c   :  { %v310_v2 = vsel %vm309_vm10, %v306_v63, %v308_v0 }
 0x12d   :  { %1328 = vmatpush.msk.msra.mxu0 %vm23_vm0, %v310_v2 }
 0x12e   :  { %1329 = vmatmul.msk.f32.vlgmr.msra.gmra.mxu0 %vm36_vm5, %v1327_v8 }
 0x133   :  { %v340_v6 = vpop.permute.xlu1 %339  ;;  %v444_v16 = vpop.permute.xlu2 %443 }
 0x134   :  { %v343_v7 = vsel %vm309_vm10, %v340_v6, %v342_v5 }
 0x135   :  { %1330 = vmatpush.msk.msra.mxu1 %vm23_vm0, %v343_v7 }
 0x136   :  { %1331 = vmatmul.msk.f32.vlgmr.msra.gmra.mxu1 %vm36_vm5, %v1327_v8 }
 0x13b   :  { %v376_v9 = vpop.permute.xlu1 %375  ;;  %v374_v10 = vpop.permute.xlu0 %373 }
 0x13c   :  { %v378_v12 = vsel %vm377_vm11, %v374_v10, %v376_v9 }
 0x13d   :  { %1333 = vmatpush.msk.msra.mxu2 %vm23_vm0, %v378_v12 }
 0x13e   :  { %1334 = vmatmul.msk.f32.vlgmr.msra.gmra.mxu2 %vm36_vm5, %v1332_v11 }
 0x143   :  { %v410_v14 = vpop.permute.xlu0 %409  ;;  %v510_v25 = vpop.permute.xlu2 %509 }
 0x144   :  { %v411_v15 = vsel %vm377_vm11, %v408_v13, %v410_v14 }
 0x145   :  { %1335 = vmatpush.msk.msra.mxu3 %vm23_vm0, %v411_v15 }
 0x146   :  { %1336 = vmatmul.msk.f32.vlgmr.msra.gmra.mxu3 %vm36_vm5, %v1332_v11 }
 0x14b   :  { %v442_v17 = vpop.permute.xlu1 %441  ;;  %v546_v29 = vpop.permute.xlu2 %545 }
 0x14c   :  { %v446_v19 = vsel %vm445_vm12, %v442_v17, %v444_v16 }
 0x14d   :  { %1338 = vmatpush.msk.msrb.mxu0 %vm23_vm0, %v446_v19 }
 0x14e   :  { %1339 = vmatmul.msk.f32.vlgmr.msrb.gmra.mxu0 %vm36_vm5, %v1337_v18 }
 0x153   :  { %v478_v20 = vpop.permute.xlu1 %477  ;;  %v476_v21 = vpop.permute.xlu0 %475 }
 0x154   :  { %v479_v22 = vsel %vm445_vm12, %v476_v21, %v478_v20 }
 0x155   :  { %1340 = vmatpush.msk.msrb.mxu1 %vm23_vm0, %v479_v22 }
 0x156   :  { %1341 = vmatmul.msk.f32.vlgmr.msrb.gmra.mxu1 %vm36_vm5, %v1337_v18  ;;  %v1523_v18 = vmov 1  }
 0x157   :  { %1396 = vset.pattern.permute.xlu1 %v1523_v18 }
 0x15b   :  { %v512_v26 = vpop.permute.xlu0 %511  ;;  %v612_v36 = vpop.permute.xlu2 %611 }
 0x15c   :  { %v514_v28 = vsel %vm513_vm13, %v510_v25, %v512_v26 }
 0x15d   :  { %1343 = vmatpush.msk.msrb.mxu2 %vm23_vm0, %v514_v28 }
 0x15e   :  { %1344 = vmatmul.msk.f32.vlgmr.msrb.gmra.mxu2 %vm36_vm5, %v1342_v27 }
 0x163   :  { %v544_v30 = vpop.permute.xlu1 %543 }
 0x164   :  { %v547_v31 = vsel %vm513_vm13, %v544_v30, %v546_v29 }
 0x165   :  { %1345 = vmatpush.msk.msrb.mxu3 %vm23_vm0, %v547_v31 }
 0x166   :  { %1346 = vmatmul.msk.f32.vlgmr.msrb.gmra.mxu3 %vm36_vm5, %v1342_v27 }
 0x16b   :  { %v580_v32 = vpop.permute.xlu1 %579  ;;  %v578_v33 = vpop.permute.xlu0 %577 }
 0x16c   :  { %v582_v35 = vsel %vm581_vm14, %v578_v33, %v580_v32 }
 0x16d   :  { %1348 = vmatpush.msk.msra.mxu0 %vm23_vm0, %v582_v35 }
 0x16e   :  { %1349 = vmatmul.msk.f32.vlgmr.msra.gmra.mxu0 %vm36_vm5, %v1347_v34 }
 0x173   :  { %v614_v37 = vpop.permute.xlu0 %613  ;;  %v114_v40 = vpop.f32.mrf.mxu1 }
 0x174   :  { %v615_v38 = vsel %vm581_vm14, %v612_v36, %v614_v37  ;;  %v162_v48 = vadd.f32 %v161_v43, %v114_v40  ;;  %v644_v7 = vpop.permute.xlu1 %643  ;;  %v1525_v36 = vmov 2  }
 0x175   :  { %1350 = vmatpush.msk.msra.mxu1 %vm23_vm0, %v615_v38  ;;  %1481 = vset.pattern.permute.xlu0 %v1525_v36 }
 0x176   :  { %1351 = vmatmul.msk.f32.vlgmr.msra.gmra.mxu1 %vm36_vm5, %v1347_v34 }
 0x183   :  { %v83_v39 = vpop.f32.mrf.mxu0 }
 0x184   :  { %v140_v46 = vadd.f32 %v139_v41, %v83_v39 }
 0x18c   :  { %v197_v42 = vpop.f32.mrf.mxu0 }
 0x18d   :  { %v230_v49 = vadd.f32 %v197_v42, %v140_v46 }
 0x194   :  { %v227_v44 = vpop.f32.mrf.mxu1 }
 0x195   :  { %v231_v51 = vadd.f32 %v227_v44, %v162_v48 }
 0x1a1   :  { %v265_v45 = vpop.f32.mrf.mxu2 }
 0x1a2   :  { %v298_v52 = vadd.f32 %v265_v45, %v230_v49 }
 0x1a9   :  { %v295_v50 = vpop.f32.mrf.mxu3 }
 0x1aa   :  { %v299_v55 = vadd.f32 %v295_v50, %v231_v51 }
 0x1ab   :  { %v333_v47 = vpop.f32.mrf.mxu0 }
 0x1ac   :  { %v366_v56 = vadd.f32 %v333_v47, %v298_v52 }
 0x1b3   :  { %v363_v53 = vpop.f32.mrf.mxu1 }
 0x1b4   :  { %v367_v59 = vadd.f32 %v363_v53, %v299_v55 }
 0x1c1   :  { %v401_v54 = vpop.f32.mrf.mxu2 }
 0x1c2   :  { %v434_v60 = vadd.f32 %v401_v54, %v366_v56  ;;  %v1352_v56 = vld [vmem:[%s1823_s3 + $0x8] sm:$0xff] }
 0x1c9   :  { %v431_v58 = vpop.f32.mrf.mxu3 }
 0x1ca   :  { %v435_v63 = vadd.f32 %v431_v58, %v367_v59 }
 0x1cb   :  { %v469_v57 = vpop.f32.mrf.mxu0 }
 0x1cc   :  { %v502_v0 = vadd.f32 %v469_v57, %v434_v60  ;;  %v716_v57 = vld [vmem:[%s1823_s3] sm:$0xff] }
 0x1d3   :  { %v499_v61 = vpop.f32.mrf.mxu1 }
 0x1d4   :  { %v503_v5 = vadd.f32 %v499_v61, %v435_v63  ;;  %v1357_v61 = vld [vmem:[%s1823_s3 + $0x10] sm:$0xff] }
 0x1e1   :  { %v537_v62 = vpop.f32.mrf.mxu2 }
 0x1e2   :  { %v570_v3 = vadd.f32 %v537_v62, %v502_v0 }
 0x1e9   :  { %v567_v4 = vpop.f32.mrf.mxu3 }
 0x1ea   :  { %v571_v8 = vadd.f32 %v567_v4, %v503_v5 }
 0x1eb   :  { %v605_v2 = vpop.f32.mrf.mxu0 }
 0x1ec   :  { %v638_v6 = vadd.f32 %v605_v2, %v570_v3 }
 0x1ee   :  { %v646_v10 = vadd.f32 %v644_v7, %v638_v6 }
 0x1f0   :  { %v651_v14 = vmul.f32 %v646_v10, %v646_v10 }
 0x1f3   :  { %v635_v9 = vpop.f32.mrf.mxu1 }
 0x1f4   :  { %v639_v11 = vadd.f32 %v635_v9, %v571_v8 }
 0x1f6   :  { %v647_v12 = vadd.f32 %v644_v7, %v639_v11  ;;  %v1360_v7 = vld [vmem:[%s1823_s3 + $0x18] sm:$0xff] }
 0x1f8   :  { %v648_v13 = vadd.f32 %v647_v12, %v646_v10  ;;  %v652_v15 = vmul.f32 %v647_v12, %v647_v12 }
 0x1fa   :  { %649 = vadd.xlane.f32.xlu2 %v648_v13  ;;  %v653_v16 = vadd.f32 %v652_v15, %v651_v14 }
 0x1fc   :  { %654 = vadd.xlane.f32.xlu0 %v653_v16 }
 0x26d   :  { %v650_v17 = vpop.xlane.xlu2 %649 }
 0x26e   :  { %v656_v19 = vmul.f32 0.00390625, %v650_v17 }
 0x26f   :  { %v655_v20 = vpop.xlane.xlu0 %654 }
 0x270   :  { %v658_v21 = vmul.f32 %v656_v19, %v656_v19  ;;  %v657_v22 = vmul.f32 0.00390625, %v655_v20 }
 0x272   :  { %v659_v25 = vsub.f32 %v657_v22, %v658_v21 }
 0x274   :  { %v660_v26 = vadd.f32 1e-05, %v659_v25  ;;  %v1774_v25 = vld [vmem:[%s1824_s4] sm:$0xff] }
 0x276   :  { %1482 = vrsqrt.f32 %v660_v26  ;;  %vm667_vm0 = vweird.f32 %v660_v26 }
 0x27c   :  { %v1483_v27 = vpop.eup %1482 }
 0x27d   :  { %v662_v28 = vmul.f32 %v1483_v27, %v660_v26  ;;  %vm668_vm15 = vweird.f32 %v1483_v27 }
 0x27e   :  { %vm669_vm1 = vmor %vm667_vm0, %vm668_vm15 }
 0x27f   :  { %v663_v29 = vmul.f32 %v1483_v27, %v662_v28 }
 0x281   :  { %v664_v30 = vmul.f32 0.5, %v663_v29 }
 0x283   :  { %v665_v31 = vsub.f32 1.5, %v664_v30 }
 0x285   :  { %v666_v32 = vmul.f32 %v1483_v27, %v665_v31 }
 0x287   :  { %v670_v33 = vsel %vm669_vm1, %v1483_v27, %v666_v32 }
 0x288   :  { %v671_v34 = vmul.f32 %v670_v33, %v1692_v23 }
 0x28a   :  { %v672_v35 = vmul.f32 %v671_v34, %v656_v19 }
 0x28c   :  { %674 = vrot.lane.b32.xlu1 %v672_v35, %s1524_s1  ;;  %v1363_v35 = vld [vmem:[%s1823_s3 + $0x20] sm:$0xff] }
 0x294   :  { %680 = vperm.xlu1 %1396, %v671_v34  }
 0x29c   :  { %1397 = vset.pattern.permute.xlu1 %v1525_v36 }
 0x2fe   :  { %v675_v37 = vpop.permute.xlu1 %674 }
 0x2ff   :  { %v677_v38 = vsub.f32 %v1692_v23, %v675_v37 }
 0x301   :  { %687 = vperm.xlu1 %1397, %v677_v38  }
 0x306   :  { %v681_v39 = vpop.permute.xlu1 %680 }
 0x307   :  { %v683_v40 = vmul.f32 %v681_v39, %v646_v10  ;;  %v684_v44 = vmul.f32 %v681_v39, %v647_v12 }
 0x309   :  { %1478 = vset.pattern.permute.xlu1 %v1522_v24 }
 0x373   :  { %v688_v41 = vpop.permute.xlu1 %687 }
 0x374   :  { %v690_v42 = vadd.f32 %v688_v41, %v683_v40  ;;  %v691_v45 = vadd.f32 %v688_v41, %v684_v44 }
 0x376   :  { %v692_v43 = vmax.f32 %v690_v42, 0.0  ;;  %v693_v23 = vmax.f32 %v691_v45, 0.0 }
 0x378   :  { %701 = vrot.lane.b32.xlu1 %v692_v43, %s1512_s20 }
 0x380   :  { %703 = vrot.lane.b32.xlu1 %v693_v23, %s1512_s20 }
 0x3ea   :  { %v702_v24 = vpop.permute.xlu1 %701 }
 0x3eb   :  { %708 = vst.msk [vmem:[#allocation3] sm:$0xff] %vm707_vm3, %v702_v24 }
 0x3ec   :  { %709 = vst.msk [vmem:[#allocation3 + $0x8] sm:$0xff] %vm36_vm5, %v702_v24 }
 0x3f2   :  { %v704_v46 = vpop.permute.xlu1 %703  ;;  %v712_v47 = vld [vmem:[#allocation3] sm:$0xff] }
 0x3f3   :  { %710 = vst.msk [vmem:[#allocation3 + $0x10] sm:$0xff] %vm707_vm3, %v704_v46  ;;  %796 = vmatpush.msrb.mxu0 %v712_v47  ;;  %v713_v1 = vld [vmem:[#allocation3 + $0x8] sm:$0xff] }
 0x3f4   :  { %711 = vst.msk [vmem:[#allocation3 + $0x18] sm:$0xff] %vm36_vm5, %v704_v46  ;;  %v1408_v48 = vpack.i.bf16 %v713_v1, %v712_v47  ;;  %1355 = vmatmul.msk.f32.vlgmr.msrb.gmra.mxu0 %vm695_vm2, %v716_v57  ;;  %v1369_v47 = vld [vmem:[%s1823_s3 + $0x30] sm:$0xff] }
 0x3f6   :  { %1409 = vrot.lane.b32.xlu0 %v1408_v48, %s1515_s23  ;;  %1399 = vrot.lane.b32.xlu2 %v1408_v48, %s1514_s0 }
 0x3fa   :  { %v714_v49 = vld [vmem:[#allocation3 + $0x10] sm:$0xff] }
 0x3fb   :  { %816 = vmatpush.msrb.mxu1 %v714_v49  ;;  %v715_v50 = vld [vmem:[#allocation3 + $0x18] sm:$0xff] }
 0x3fc   :  { %v1423_v51 = vpack.i.bf16 %v715_v50, %v714_v49  ;;  %1356 = vmatmul.msk.f32.vlgmr.msrb.gmra.mxu1 %vm695_vm2, %v716_v57 }
 0x3fe   :  { %1429 = vrot.lane.b32.xlu0 %v1408_v48, %s1516_s24  ;;  %1424 = vrot.lane.b32.xlu2 %v1423_v51, %s1517_s25 }
 0x3ff   :  { %1404 = vrot.lane.b32.xlu1 %v1423_v51, %s1514_s0 }
 0x406   :  { %1444 = vrot.lane.b32.xlu0 %v1423_v51, %s1519_s27  ;;  %1439 = vrot.lane.b32.xlu2 %v1408_v48, %s1519_s27 }
 0x407   :  { %1414 = vrot.lane.b32.xlu1 %v1423_v51, %s1515_s23 }
 0x40e   :  { %1459 = vrot.lane.b32.xlu0 %v1408_v48, %s1521_s29  ;;  %1454 = vrot.lane.b32.xlu2 %v1423_v51, %s1518_s26 }
 0x40f   :  { %1419 = vrot.lane.b32.xlu1 %v1408_v48, %s1517_s25 }
 0x416   :  { %1474 = vrot.lane.b32.xlu0 %v1423_v51, %s1520_s28  ;;  %1469 = vrot.lane.b32.xlu2 %v1408_v48, %s1520_s28 }
 0x417   :  { %1434 = vrot.lane.b32.xlu1 %v1423_v51, %s1516_s24 }
 0x41f   :  { %1449 = vrot.lane.b32.xlu1 %v1408_v48, %s1518_s26 }
 0x427   :  { %1464 = vrot.lane.b32.xlu1 %v1423_v51, %s1521_s29 }
 0x42f   :  { %1237 = vperm.xlu1 %1478, %v1774_v25  }
 0x437   :  { %1479 = vset.pattern.permute.xlu1 %v1523_v18 }
 0x450   :  { %v1400_v52 = vpop.permute.xlu2 %1399 }
 0x451   :  { %v1402_v53 = vunpack.i.h.bf16 %v1400_v52  ;;  %v1401_v54 = vunpack.i.l.bf16 %v1400_v52 }
 0x453   :  { %v725_v55 = vsel %vm59_vm7, %v1401_v54, %v1402_v53  ;;  %v1366_v54 = vld [vmem:[%s1823_s3 + $0x28] sm:$0xff] }
 0x454   :  { %745 = vmatpush.msra.mxu2 %v725_v55 }
 0x455   :  { %1353 = vmatmul.msk.f32.vlgmr.msra.gmra.mxu2 %vm695_vm2, %v1352_v56 }
 0x458   :  { %v1425_v0 = vpop.permute.xlu2 %1424 }
 0x459   :  { %v1427_v11 = vunpack.i.h.bf16 %v1425_v0  ;;  %v1426_v12 = vunpack.i.l.bf16 %v1425_v0 }
 0x45b   :  { %v974_v21 = vsel %vm309_vm10, %v1426_v12, %v1427_v11 }
 0x460   :  { %v1440_v16 = vpop.permute.xlu2 %1439 }
 0x461   :  { %v1442_v27 = vunpack.i.h.bf16 %v1440_v16  ;;  %v1441_v28 = vunpack.i.l.bf16 %v1440_v16 }
 0x463   :  { %v1063_v38 = vsel %vm445_vm12, %v1441_v28, %v1442_v27 }
 0x468   :  { %v1410_v58 = vpop.permute.xlu0 %1409  ;;  %v1455_v37 = vpop.permute.xlu2 %1454 }
 0x469   :  { %v1412_v59 = vunpack.i.h.bf16 %v1410_v58  ;;  %v1411_v60 = vunpack.i.l.bf16 %v1410_v58  ;;  %v1457_v42 = vunpack.i.h.bf16 %v1455_v37  ;;  %v1456_v43 = vunpack.i.l.bf16 %v1455_v37 }
 0x46b   :  { %v827_v62 = vsel %vm173_vm8, %v1411_v60, %v1412_v59  ;;  %v1033_v1 = vsel %vm377_vm11, %v1456_v43, %v1457_v42 }
 0x46c   :  { %847 = vmatpush.msrb.mxu2 %v827_v62 }
 0x46d   :  { %1358 = vmatmul.msk.f32.vlgmr.msrb.gmra.mxu2 %vm695_vm2, %v1357_v61 }
 0x470   :  { %v1430_v63 = vpop.permute.xlu0 %1429  ;;  %v1470_v48 = vpop.permute.xlu2 %1469 }
 0x471   :  { %v1432_v2 = vunpack.i.h.bf16 %v1430_v63  ;;  %v1431_v3 = vunpack.i.l.bf16 %v1430_v63  ;;  %v1405_v4 = vpop.permute.xlu1 %1404  ;;  %v1472_v50 = vunpack.i.h.bf16 %v1470_v48  ;;  %v1471_v51 = vunpack.i.l.bf16 %v1470_v48 }
 0x472   :  { %v1407_v5 = vunpack.i.h.bf16 %v1405_v4  ;;  %v1406_v6 = vunpack.i.l.bf16 %v1405_v4 }
 0x473   :  { %v886_v8 = vsel %vm241_vm9, %v1431_v3, %v1432_v2  ;;  %v1122_v57 = vsel %vm513_vm13, %v1471_v51, %v1472_v50  ;;  %v798_v3 = vpop.f32.mrf.mxu0 }
 0x474   :  { %v756_v9 = vsel %vm59_vm7, %v1406_v6, %v1407_v5  ;;  %906 = vmatpush.msra.mxu0 %v886_v8 }
 0x475   :  { %773 = vmatpush.msra.mxu3 %v756_v9  ;;  %1361 = vmatmul.msk.f32.vlgmr.msra.gmra.mxu0 %vm695_vm2, %v1360_v7 }
 0x476   :  { %1354 = vmatmul.msk.f32.vlgmr.msra.gmra.mxu3 %vm695_vm2, %v1352_v56  ;;  %v1375_v56 = vld [vmem:[%s1823_s3 + $0x40] sm:$0xff] }
 0x478   :  { %v1445_v10 = vpop.permute.xlu0 %1444 }
 0x479   :  { %v1415_v13 = vpop.permute.xlu1 %1414  ;;  %v1447_v17 = vunpack.i.h.bf16 %v1445_v10  ;;  %v1446_v19 = vunpack.i.l.bf16 %v1445_v10  ;;  %v818_v4 = vpop.f32.mrf.mxu1 }
 0x47a   :  { %v1417_v14 = vunpack.i.h.bf16 %v1415_v13  ;;  %v1416_v15 = vunpack.i.l.bf16 %v1415_v13 }
 0x47b   :  { %v1092_v22 = vsel %vm445_vm12, %v1446_v19, %v1447_v17 }
 0x47c   :  { %v856_v20 = vsel %vm173_vm8, %v1416_v15, %v1417_v14 }
 0x47d   :  { %873 = vmatpush.msrb.mxu3 %v856_v20 }
 0x47e   :  { %1359 = vmatmul.msk.f32.vlgmr.msrb.gmra.mxu3 %vm695_vm2, %v1357_v61  ;;  %v1372_v61 = vld [vmem:[%s1823_s3 + $0x38] sm:$0xff]  ;;  %s1526_s3 = smov [#allocation4]  }
 0x47f   :  { %991 = vmatpush.msra.mxu3 %v974_v21  ;;  %s1294_s17 = sshll.u32 %s1526_s3, 4  ;;  %s1295_s17 = int_to_ptr.vmem [resolvable:$true] %s1294_s17 }
 0x480   :  { %v1460_v26 = vpop.permute.xlu0 %1459 }
 0x481   :  { %1109 = vmatpush.msrb.mxu3 %v1092_v22  ;;  %v1420_v29 = vpop.permute.xlu1 %1419  ;;  %v1462_v32 = vunpack.i.h.bf16 %v1460_v26  ;;  %v1461_v33 = vunpack.i.l.bf16 %v1460_v26 }
 0x482   :  { %v1422_v30 = vunpack.i.h.bf16 %v1420_v29  ;;  %v1421_v31 = vunpack.i.l.bf16 %v1420_v29 }
 0x483   :  { %v1181_v39 = vsel %vm581_vm14, %v1461_v33, %v1462_v32 }
 0x484   :  { %v945_v34 = vsel %vm309_vm10, %v1421_v31, %v1422_v30 }
 0x485   :  { %965 = vmatpush.msra.mxu2 %v945_v34 }
 0x486   :  { %1364 = vmatmul.msk.f32.vlgmr.msra.gmra.mxu2 %vm695_vm2, %v1363_v35  ;;  %1365 = vmatmul.msk.f32.vlgmr.msra.gmra.mxu3 %vm695_vm2, %v1363_v35 }
 0x487   :  { %1083 = vmatpush.msrb.mxu2 %v1063_v38 }
 0x488   :  { %v1475_v40 = vpop.permute.xlu0 %1474 }
 0x489   :  { %1201 = vmatpush.msra.mxu2 %v1181_v39  ;;  %v1435_v41 = vpop.permute.xlu1 %1434  ;;  %v1477_v23 = vunpack.i.h.bf16 %v1475_v40  ;;  %v1476_v24 = vunpack.i.l.bf16 %v1475_v40 }
 0x48a   :  { %v1437_v44 = vunpack.i.h.bf16 %v1435_v41  ;;  %v1436_v45 = vunpack.i.l.bf16 %v1435_v41 }
 0x48b   :  { %v1151_v18 = vsel %vm513_vm13, %v1476_v24, %v1477_v23 }
 0x48c   :  { %v915_v46 = vsel %vm241_vm9, %v1436_v45, %v1437_v44 }
 0x48d   :  { %932 = vmatpush.msra.mxu1 %v915_v46 }
 0x48e   :  { %1362 = vmatmul.msk.f32.vlgmr.msra.gmra.mxu1 %vm695_vm2, %v1360_v7  ;;  %1370 = vmatmul.msk.f32.vlgmr.msrb.gmra.mxu2 %vm695_vm2, %v1369_v47 }
 0x48f   :  { %1050 = vmatpush.msrb.mxu1 %v1033_v1  ;;  %1371 = vmatmul.msk.f32.vlgmr.msrb.gmra.mxu3 %vm695_vm2, %v1369_v47 }
 0x491   :  { %1168 = vmatpush.msra.mxu1 %v1151_v18  ;;  %v1450_v49 = vpop.permute.xlu1 %1449 }
 0x492   :  { %v1452_v52 = vunpack.i.h.bf16 %v1450_v49  ;;  %v1451_v53 = vunpack.i.l.bf16 %v1450_v49 }
 0x494   :  { %v1004_v55 = vsel %vm377_vm11, %v1451_v53, %v1452_v52 }
 0x495   :  { %1024 = vmatpush.msrb.mxu0 %v1004_v55 }
 0x496   :  { %1367 = vmatmul.msk.f32.vlgmr.msrb.gmra.mxu0 %vm695_vm2, %v1366_v54  ;;  %1368 = vmatmul.msk.f32.vlgmr.msrb.gmra.mxu1 %vm695_vm2, %v1366_v54 }
 0x497   :  { %1142 = vmatpush.msra.mxu0 %v1122_v57  ;;  %1376 = vmatmul.msk.f32.vlgmr.msra.gmra.mxu2 %vm695_vm2, %v1375_v56 }
 0x499   :  { %v1465_v58 = vpop.permute.xlu1 %1464 }
 0x49a   :  { %v1467_v59 = vunpack.i.h.bf16 %v1465_v58  ;;  %v1466_v60 = vunpack.i.l.bf16 %v1465_v58 }
 0x49c   :  { %v1210_v62 = vsel %vm581_vm14, %v1466_v60, %v1467_v59 }
 0x49d   :  { %1227 = vmatpush.msra.mxu3 %v1210_v62 }
 0x49e   :  { %1373 = vmatmul.msk.f32.vlgmr.msra.gmra.mxu0 %vm695_vm2, %v1372_v61  ;;  %1374 = vmatmul.msk.f32.vlgmr.msra.gmra.mxu1 %vm695_vm2, %v1372_v61 }
 0x49f   :  { %1377 = vmatmul.msk.f32.vlgmr.msra.gmra.mxu3 %vm695_vm2, %v1375_v56 }
 0x4a1   :  { %v1238_v35 = vpop.permute.xlu1 %1237 }
 0x4d8   :  { %v747_v63 = vpop.f32.mrf.mxu2 }
 0x4d9   :  { %v799_v6 = vadd.f32 %v798_v3, %v747_v63 }
 0x4f0   :  { %v849_v2 = vpop.f32.mrf.mxu2 }
 0x4f1   :  { %v878_v10 = vadd.f32 %v849_v2, %v799_v6 }
 0x4f2   :  { %v908_v8 = vpop.f32.mrf.mxu0 }
 0x4f3   :  { %v937_v13 = vadd.f32 %v908_v8, %v878_v10 }
 0x4f9   :  { %v775_v0 = vpop.f32.mrf.mxu3 }
 0x4fa   :  { %v819_v11 = vadd.f32 %v818_v4, %v775_v0 }
 0x501   :  { %v875_v5 = vpop.f32.mrf.mxu3 }
 0x502   :  { %v879_v15 = vadd.f32 %v875_v5, %v819_v11 }
 0x509   :  { %v967_v7 = vpop.f32.mrf.mxu2  ;;  %v993_v12 = vpop.f32.mrf.mxu3 }
 0x50a   :  { %v996_v17 = vadd.f32 %v967_v7, %v937_v13 }
 0x50b   :  { %v934_v9 = vpop.f32.mrf.mxu1 }
 0x50c   :  { %v938_v20 = vadd.f32 %v934_v9, %v879_v15 }
 0x50e   :  { %v997_v22 = vadd.f32 %v993_v12, %v938_v20 }
 0x511   :  { %v1085_v14 = vpop.f32.mrf.mxu2 }
 0x512   :  { %v1111_v27 = vpop.f32.mrf.mxu3 }
 0x513   :  { %v1026_v16 = vpop.f32.mrf.mxu0  ;;  %v1052_v19 = vpop.f32.mrf.mxu1 }
 0x514   :  { %v1055_v21 = vadd.f32 %v1026_v16, %v996_v17  ;;  %v1056_v28 = vadd.f32 %v1052_v19, %v997_v22 }
 0x516   :  { %v1114_v26 = vadd.f32 %v1085_v14, %v1055_v21  ;;  %v1115_v33 = vadd.f32 %v1111_v27, %v1056_v28 }
 0x51a   :  { %v1203_v31 = vpop.f32.mrf.mxu2 }
 0x51b   :  { %v1144_v29 = vpop.f32.mrf.mxu0  ;;  %v1170_v32 = vpop.f32.mrf.mxu1 }
 0x51c   :  { %v1173_v30 = vadd.f32 %v1144_v29, %v1114_v26  ;;  %v1174_v37 = vadd.f32 %v1170_v32, %v1115_v33 }
 0x51e   :  { %v1232_v34 = vadd.f32 %v1203_v31, %v1173_v30 }
 0x520   :  { %v1240_v39 = vadd.f32 %v1238_v35, %v1232_v34 }
 0x522   :  { %v1229_v38 = vpop.f32.mrf.mxu3  ;;  %v1245_v43 = vmul.f32 %v1240_v39, %v1240_v39 }
 0x523   :  { %v1233_v40 = vadd.f32 %v1229_v38, %v1174_v37 }
 0x525   :  { %v1241_v41 = vadd.f32 %v1238_v35, %v1233_v40 }
 0x527   :  { %v1242_v42 = vadd.f32 %v1241_v41, %v1240_v39  ;;  %v1246_v44 = vmul.f32 %v1241_v41, %v1241_v41 }
 0x529   :  { %1243 = vadd.xlane.f32.xlu2 %v1242_v42  ;;  %v1247_v45 = vadd.f32 %v1246_v44, %v1245_v43 }
 0x52b   :  { %1248 = vadd.xlane.f32.xlu0 %v1247_v45 }
 0x59c   :  { %v1244_v23 = vpop.xlane.xlu2 %1243 }
 0x59d   :  { %v1250_v24 = vmul.f32 0.00390625, %v1244_v23 }
 0x59e   :  { %v1249_v46 = vpop.xlane.xlu0 %1248 }
 0x59f   :  { %v1252_v47 = vmul.f32 %v1250_v24, %v1250_v24  ;;  %v1251_v1 = vmul.f32 0.00390625, %v1249_v46 }
 0x5a1   :  { %v1253_v48 = vsub.f32 %v1251_v1, %v1252_v47 }
 0x5a3   :  { %v1254_v18 = vadd.f32 1e-05, %v1253_v48 }
 0x5a5   :  { %1484 = vrsqrt.f32 %v1254_v18  ;;  %vm1261_vm5 = vweird.f32 %v1254_v18 }
 0x5ab   :  { %v1485_v49 = vpop.eup %1484 }
 0x5ac   :  { %v1256_v50 = vmul.f32 %v1485_v49, %v1254_v18  ;;  %vm1262_vm4 = vweird.f32 %v1485_v49 }
 0x5ad   :  { %vm1263_vm6 = vmor %vm1261_vm5, %vm1262_vm4 }
 0x5ae   :  { %v1257_v51 = vmul.f32 %v1485_v49, %v1256_v50 }
 0x5b0   :  { %v1258_v52 = vmul.f32 0.5, %v1257_v51 }
 0x5b2   :  { %v1259_v53 = vsub.f32 1.5, %v1258_v52 }
 0x5b4   :  { %v1260_v54 = vmul.f32 %v1485_v49, %v1259_v53 }
 0x5b6   :  { %v1264_v55 = vsel %vm1263_vm6, %v1485_v49, %v1260_v54 }
 0x5b7   :  { %v1265_v56 = vmul.f32 %v1264_v55, %v1774_v25 }
 0x5b9   :  { %v1266_v57 = vmul.f32 %v1265_v56, %v1250_v24 }
 0x5bb   :  { %1268 = vrot.lane.b32.xlu1 %v1266_v57, %s1524_s1 }
 0x5c3   :  { %1274 = vperm.xlu1 %1479, %v1265_v56  }
 0x5cb   :  { %1480 = vset.pattern.permute.xlu1 %v1525_v36 }
 0x62d   :  { %v1269_v58 = vpop.permute.xlu1 %1268 }
 0x62e   :  { %v1271_v59 = vsub.f32 %v1774_v25, %v1269_v58 }
 0x630   :  { %1281 = vperm.xlu1 %1480, %v1271_v59  }
 0x635   :  { %v1275_v60 = vpop.permute.xlu1 %1274 }
 0x636   :  { %v1277_v61 = vmul.f32 %v1275_v60, %v1240_v39  ;;  %v1278_v62 = vmul.f32 %v1275_v60, %v1241_v41 }
 0x6a2   :  { %v1282_v63 = vpop.permute.xlu1 %1281 }
 0x6a3   :  { %v1284_v0 = vadd.f32 %v1282_v63, %v1277_v61  ;;  %v1285_v2 = vadd.f32 %v1282_v63, %v1278_v62 }
 0x6a5   :  { %v1286_v3 = vmax.f32 %v1284_v0, 0.0  ;;  %v1287_v4 = vmax.f32 %v1285_v2, 0.0 }
 0x6a7   :  { %1288 = vst [vmem:[#allocation4] sm:$0xff] %v1286_v3 }
 0x6a8   :  { %1289 = vst [vmem:[#allocation4 + $0x8] sm:$0xff] %v1287_v4 }
 0x6a9   :  { %1302 = dma.vmem_to_hbm [thread:$0]  %s1295_s17, 256, %s1297_s21, [#allocation5], %s1527_s22, %s1527_s22, %s1528_s30  }
 0x6aa   :  { %1510 = dma.done.wait [#allocation5], 256  }
 0x6ab   :  { %1511 = vsyncadd [#allocation5], 4294967040 }
 0x6ac   :  { %1307 = vsyncpa [#allocation5], 1 }

</bundles_post_ra>
